<compile_context>
chip_gen: v5e
topology: v5e:2x2
jax: 0.10.0
libtpu: 0.0.40
codegen_flags: <defaults>
</compile_context>

<pallas_src>
import math

import jax
import jax.numpy as jnp
from jax.experimental import pallas as pl
from jax.experimental.pallas import tpu as pltpu

LANE = 128


def _round_up(x, m):
    return ((x + m - 1) // m) * m


def _divisor_tile(total, cap):
    """Largest multiple of LANE that divides `total` and is <= cap (>= LANE)."""
    cap = max(LANE, min(cap, total))
    best = LANE
    t = LANE
    while t <= cap:
        if total % t == 0:
            best = t
        t += LANE
    return best


def prepare_adjacency(adj, dtype=jnp.bfloat16):
    """One-time cast + pad of the dense adjacency (call once, reuse per layer).

    NOTE: the bf16 cast is lossless only because GCN adjacency entries are
    exactly 0/1.  For weighted / pre-normalized adjacencies pass dtype=float32.
    """
    n = adj.shape[0]
    np_ = _round_up(n, LANE)
    a = adj.astype(dtype)
    if np_ != n:
        a = jnp.zeros((np_, np_), dtype).at[:n, :n].set(a)
    return a


# ---------------------------------------------------------------------------
# Fused kernel over grid (i = output row block, k = adjacency column block):
#   hw_k     = (h_k @ W) * norm_k                      (f32, recomputed per step)
#   o[i]    += A[i, k] @ hw_k                          (bf16 MXU by default)
#   o[i]     = relu(o[i] * norm_i + bias)              (last k step, in place)
# ---------------------------------------------------------------------------
def _make_gcn_kernel(agg_dtype):
    def kernel(adj_ref, h_ref, w_ref, nk_ref, ni_ref, b_ref, o_ref):
        k = pl.program_id(1)

        @pl.when(k == 0)
        def _init():
            o_ref[...] = jnp.zeros_like(o_ref)

        # Fused transform for this k block (in_feats << tm, so recompute is cheap).
        hw = jnp.dot(h_ref[...], w_ref[...], preferred_element_type=jnp.float32)
        hw = hw * nk_ref[...]

        a = adj_ref[...]
        if agg_dtype == jnp.float32:
            # Precise mode: widen the 0/1 adjacency (lossless) -> exact f32 agg.
            a = a.astype(jnp.float32)
        else:
            # Fast mode: bf16 x bf16 -> f32 MXU matmul; adjacency is exact in
            # bf16, hw is rounded once to bf16.
            hw = hw.astype(agg_dtype)
        o_ref[...] += jnp.dot(a, hw, preferred_element_type=jnp.float32)

        @pl.when(k == pl.num_programs(1) - 1)
        def _epilogue():
            o_ref[...] = jnp.maximum(
                o_ref[...] * ni_ref[...] + b_ref[...], 0.0)

    return kernel


def gcn_layer(h, weight, adj, norm, bias, *, precise=False,
              tm_cap=2048, tk_cap=512):
    """GCN layer forward: relu((A @ ((h @ W) * norm)) * norm + bias).

    `adj` may be the raw (N, N) float adjacency or (preferably) the output of
    prepare_adjacency() so the bf16 cast/padding is done once per graph.
    """
    N, in_feats = h.shape
    out_feats = weight.shape[1]
    fp = _round_up(out_feats, LANE)          # lane-dense output features
    np_ = _round_up(N, LANE)                 # pad nodes only to 128, not tile

    if adj.shape != (np_, np_) or adj.dtype != jnp.bfloat16:
        adj = prepare_adjacency(adj)         # convenience; prefer pre-preparing

    norm = norm.reshape(-1, 1)
    bias = bias.reshape(1, -1)

    if np_ != N:
        h_p = jnp.zeros((np_, in_feats), h.dtype).at[:N].set(h)
        n_p = jnp.zeros((np_, 1), norm.dtype).at[:N].set(norm)
    else:
        h_p, n_p = h, norm
    if fp != out_feats:
        w_p = jnp.zeros((in_feats, fp), weight.dtype).at[:, :out_feats].set(weight)
        b_p = jnp.zeros((1, fp), bias.dtype).at[:, :out_feats].set(bias)
    else:
        w_p, b_p = weight, bias

    # Tile selection: big row blocks to amortize per-step overhead and cut the
    # per-row-block h/norm re-reads; keep >= 2 row blocks when possible so the
    # "parallel" axis can shard across two TensorCores (v7x megacore).
    tm = _divisor_tile(np_, min(tm_cap, np_ // 2 if np_ >= 2 * LANE else np_))
    tk = _divisor_tile(np_, tk_cap)
    grid = (np_ // tm, np_ // tk)

    flops = 2 * np_ * np_ * fp + grid[0] * 2 * np_ * in_feats * fp
    bytes_accessed = (np_ * np_ * 2                          # bf16 adjacency stream
                      + grid[0] * np_ * (in_feats * 4 + 4)   # h + pre-agg norm re-reads
                      + np_ * fp * 4                         # output
                      + np_ * 4 + in_feats * fp * 4 + fp * 4)

    out = pl.pallas_call(
        _make_gcn_kernel(jnp.float32 if precise else jnp.bfloat16),
        out_shape=jax.ShapeDtypeStruct((np_, fp), jnp.float32),
        grid_spec=pltpu.PrefetchScalarGridSpec(
            num_scalar_prefetch=0,
            grid=grid,
            in_specs=[
                pl.BlockSpec((tm, tk), lambda i, k: (i, k)),        # A tile (bf16)
                pl.BlockSpec((tk, in_feats), lambda i, k: (k, 0)),  # h rows of block k
                pl.BlockSpec((in_feats, fp), lambda i, k: (0, 0)),  # W (resident)
                pl.BlockSpec((tk, 1), lambda i, k: (k, 0)),         # pre-agg norm
                pl.BlockSpec((tm, 1), lambda i, k: (i, 0)),         # post-agg norm
                pl.BlockSpec((1, fp), lambda i, k: (0, 0)),         # bias
            ],
            out_specs=pl.BlockSpec((tm, fp), lambda i, k: (i, 0)),
        ),
        compiler_params=pltpu.CompilerParams(
            dimension_semantics=("parallel", "arbitrary"),
            vmem_limit_bytes=32 * 1024 * 1024),
        cost_estimate=pl.CostEstimate(
            flops=flops, transcendentals=0, bytes_accessed=bytes_accessed),
    )(adj, h_p, w_p, n_p, n_p, b_p)

    return out[:N, :out_feats]


def gcn_reference(h, weight, adj, norm, bias):
    hw = (h @ weight) * norm
    agg = adj @ hw
    return jnp.maximum(agg * norm + bias, 0.0)


if __name__ == "__main__":
    key = jax.random.PRNGKey(0)
    N = 128          # number of graph nodes
    in_feats = 32
    out_feats = 16

    k_h, k_w, k_b, k_adj = jax.random.split(key, 4)

    # Node features.
    h = jax.random.normal(k_h, (N, in_feats), dtype=jnp.float32)

    # Parameters, initialized like reset_parameters(): U(-stdv, stdv), stdv = 1/sqrt(out_feats).
    stdv = 1.0 / math.sqrt(out_feats)
    weight = jax.random.uniform(k_w, (in_feats, out_feats),
                                minval=-stdv, maxval=stdv, dtype=jnp.float32)
    bias = jax.random.uniform(k_b, (1, out_feats),
                              minval=-stdv, maxval=stdv, dtype=jnp.float32)

    # Synthetic undirected graph with self-loops; norm = deg^{-1/2} as in DGL GCN.
    rand = jax.random.uniform(k_adj, (N, N))
    adj = (rand + rand.T > 1.6).astype(jnp.float32)
    adj = jnp.maximum(adj, jnp.eye(N, dtype=jnp.float32))   # self-loops
    deg = adj.sum(axis=1, keepdims=True)
    norm = 1.0 / jnp.sqrt(deg)                               # [N, 1]

    # One-time adjacency prep (bf16 cast + pad to a 128 multiple), reused per call.
    adj_prep = jax.block_until_ready(prepare_adjacency(adj))

    ref = gcn_reference(h, weight, adj, norm, bias)

    # Fast path: bf16 x bf16 aggregation on the MXU (hw rounded once to bf16).
    out_fast = jax.block_until_ready(gcn_layer(h, weight, adj_prep, norm, bias))
    # Precise path: f32 aggregation (lossless adjacency widen), matches f32 ref tightly.
    out_precise = jax.block_until_ready(
        gcn_layer(h, weight, adj_prep, norm, bias, precise=True))

    assert out_fast.shape == (N, out_feats)
    assert out_precise.shape == (N, out_feats)
    assert jnp.allclose(out_precise, ref, atol=1e-4, rtol=1e-4), \
        "precise-mode mismatch vs reference"
    assert jnp.allclose(out_fast, ref, atol=2e-2, rtol=2e-2), \
        "fast-mode (bf16 aggregation) mismatch vs reference"

    print("KERNEL_OK")
</pallas_src>

<mosaic_0001>
module attributes {stable_mosaic.version = 11 : i64} {
  func.func @kernel(%arg0: i32, %arg1: i32, %arg2: memref<128x128xbf16, #tpu.memory_space<vmem>>, %arg3: memref<128x32xf32, #tpu.memory_space<vmem>>, %arg4: memref<32x128xf32, #tpu.memory_space<vmem>>, %arg5: memref<128x1xf32, #tpu.memory_space<vmem>>, %arg6: memref<128x1xf32, #tpu.memory_space<vmem>>, %arg7: memref<1x128xf32, #tpu.memory_space<vmem>>, %arg8: memref<128x128xf32, #tpu.memory_space<vmem>>) attributes {dimension_semantics = [#tpu.dimension_semantics<parallel>, #tpu.dimension_semantics<arbitrary>], iteration_bounds = array<i64: 1, 1>, scalar_prefetch = 0 : i64, scratch_operands = 0 : i64, tpu.core_type = #tpu.core_type<tc>, window_params = [{transform_indices = @transform_0, window_bounds = array<i64: 128, 128>}, {transform_indices = @transform_1, window_bounds = array<i64: 128, 32>}, {pipeline_mode = #tpu.pipeline_mode<synchronous>, transform_indices = @transform_2, window_bounds = array<i64: 32, 128>}, {transform_indices = @transform_3, window_bounds = array<i64: 128, 1>}, {transform_indices = @transform_4, window_bounds = array<i64: 128, 1>}, {pipeline_mode = #tpu.pipeline_mode<synchronous>, transform_indices = @transform_5, window_bounds = array<i64: 1, 128>}, {transform_indices = @transform_6, window_bounds = array<i64: 128, 128>}]} {
    %c0_i32 = arith.constant 0 : i32
    %0 = arith.cmpi eq, %arg1, %c0_i32 : i32
    %1 = arith.extui %0 : i1 to i32
    %c0_i32_0 = arith.constant 0 : i32
    %2 = arith.cmpi ne, %1, %c0_i32_0 : i32
    scf.if %2 {
      %cst_15 = arith.constant 0.000000e+00 : f32
      %18 = vector.broadcast %cst_15 : f32 to vector<128x128xf32>
      %c0_16 = arith.constant 0 : index
      %c0_17 = arith.constant 0 : index
      %19 = vector.load %arg8[%c0_16, %c0_17] : memref<128x128xf32, #tpu.memory_space<vmem>>, vector<128x128xf32>
      tpu.vector_store %arg8[%c0_16, %c0_17], %18 {strides = array<i32>} : memref<128x128xf32, #tpu.memory_space<vmem>>, vector<128x128xf32>,
    } else {
    }
    %c0 = arith.constant 0 : index
    %c0_1 = arith.constant 0 : index
    %3 = vector.load %arg3[%c0, %c0_1] : memref<128x32xf32, #tpu.memory_space<vmem>>, vector<128x32xf32>
    %c0_2 = arith.constant 0 : index
    %c0_3 = arith.constant 0 : index
    %4 = vector.load %arg4[%c0_2, %c0_3] : memref<32x128xf32, #tpu.memory_space<vmem>>, vector<32x128xf32>
    %cst = arith.constant dense<0.000000e+00> : vector<128x128xf32>
    %5 = tpu.matmul %3, %4, %cst {dimension_numbers = #tpu.dot_dimension_numbers<[1], [0], [0], [1], [0, 0, 1, 1], [], []>} : vector<128x32xf32>, vector<32x128xf32>, vector<128x128xf32> -> vector<128x128xf32>
    %c0_4 = arith.constant 0 : index
    %c0_5 = arith.constant 0 : index
    %6 = vector.load %arg5[%c0_4, %c0_5] : memref<128x1xf32, #tpu.memory_space<vmem>>, vector<128x1xf32>
    %7 = vector.broadcast %6 : vector<128x1xf32> to vector<128x128xf32>
    %8 = arith.mulf %5, %7 : vector<128x128xf32>
    %c0_6 = arith.constant 0 : index
    %c0_7 = arith.constant 0 : index
    %9 = vector.load %arg2[%c0_6, %c0_7] : memref<128x128xbf16, #tpu.memory_space<vmem>>, vector<128x128xbf16>
    %10 = arith.truncf %8 : vector<128x128xf32> to vector<128x128xbf16>
    %c0_8 = arith.constant 0 : index
    %c0_9 = arith.constant 0 : index
    %11 = vector.load %arg8[%c0_8, %c0_9] : memref<128x128xf32, #tpu.memory_space<vmem>>, vector<128x128xf32>
    %cst_10 = arith.constant dense<0.000000e+00> : vector<128x128xf32>
    %12 = tpu.matmul %9, %10, %cst_10 {dimension_numbers = #tpu.dot_dimension_numbers<[1], [0], [0], [1], [0, 0, 1, 1], [], []>} : vector<128x128xbf16>, vector<128x128xbf16>, vector<128x128xf32> -> vector<128x128xf32>
    %13 = arith.addf %11, %12 : vector<128x128xf32>
    %c0_11 = arith.constant 0 : index
    %c0_12 = arith.constant 0 : index
    %14 = vector.load %arg8[%c0_11, %c0_12] : memref<128x128xf32, #tpu.memory_space<vmem>>, vector<128x128xf32>
    tpu.vector_store %arg8[%c0_11, %c0_12], %13 {strides = array<i32>} : memref<128x128xf32, #tpu.memory_space<vmem>>, vector<128x128xf32>,
    %c0_i32_13 = arith.constant 0 : i32
    %15 = arith.cmpi eq, %arg1, %c0_i32_13 : i32
    %16 = arith.extui %15 : i1 to i32
    %c0_i32_14 = arith.constant 0 : i32
    %17 = arith.cmpi ne, %16, %c0_i32_14 : i32
    scf.if %17 {
      %c0_15 = arith.constant 0 : index
      %c0_16 = arith.constant 0 : index
      %18 = vector.load %arg8[%c0_15, %c0_16] : memref<128x128xf32, #tpu.memory_space<vmem>>, vector<128x128xf32>
      %c0_17 = arith.constant 0 : index
      %c0_18 = arith.constant 0 : index
      %19 = vector.load %arg6[%c0_17, %c0_18] : memref<128x1xf32, #tpu.memory_space<vmem>>, vector<128x1xf32>
      %20 = vector.broadcast %19 : vector<128x1xf32> to vector<128x128xf32>
      %21 = arith.mulf %18, %20 : vector<128x128xf32>
      %c0_19 = arith.constant 0 : index
      %c0_20 = arith.constant 0 : index
      %22 = vector.load %arg7[%c0_19, %c0_20] : memref<1x128xf32, #tpu.memory_space<vmem>>, vector<1x128xf32>
      %23 = vector.broadcast %22 : vector<1x128xf32> to vector<128x128xf32>
      %24 = arith.addf %21, %23 : vector<128x128xf32>
      %cst_21 = arith.constant 0.000000e+00 : f32
      %25 = vector.broadcast %cst_21 : f32 to vector<128x128xf32>
      %26 = arith.maximumf %24, %25 : vector<128x128xf32>
      %c0_22 = arith.constant 0 : index
      %c0_23 = arith.constant 0 : index
      %27 = vector.load %arg8[%c0_22, %c0_23] : memref<128x128xf32, #tpu.memory_space<vmem>>, vector<128x128xf32>
      tpu.vector_store %arg8[%c0_22, %c0_23], %26 {strides = array<i32>} : memref<128x128xf32, #tpu.memory_space<vmem>>, vector<128x128xf32>,
    } else {
    }
    return
  }
  func.func @transform_0(%arg0: i32, %arg1: i32) -> (i32, i32) {
    %c0_i32 = arith.constant 0 : i32
    return %arg0, %arg1 : i32, i32
  }
  func.func @transform_1(%arg0: i32, %arg1: i32) -> (i32, i32) {
    %c0_i32 = arith.constant 0 : i32
    %c0_i32_0 = arith.constant 0 : i32
    return %arg1, %c0_i32 : i32, i32
  }
  func.func @transform_2(%arg0: i32, %arg1: i32) -> (i32, i32) {
    %c0_i32 = arith.constant 0 : i32
    %c0_i32_0 = arith.constant 0 : i32
    %c0_i32_1 = arith.constant 0 : i32
    return %c0_i32, %c0_i32_0 : i32, i32
  }
  func.func @transform_3(%arg0: i32, %arg1: i32) -> (i32, i32) {
    %c0_i32 = arith.constant 0 : i32
    %c0_i32_0 = arith.constant 0 : i32
    return %arg1, %c0_i32 : i32, i32
  }
  func.func @transform_4(%arg0: i32, %arg1: i32) -> (i32, i32) {
    %c0_i32 = arith.constant 0 : i32
    %c0_i32_0 = arith.constant 0 : i32
    return %arg0, %c0_i32 : i32, i32
  }
  func.func @transform_5(%arg0: i32, %arg1: i32) -> (i32, i32) {
    %c0_i32 = arith.constant 0 : i32
    %c0_i32_0 = arith.constant 0 : i32
    %c0_i32_1 = arith.constant 0 : i32
    return %c0_i32, %c0_i32_0 : i32, i32
  }
  func.func @transform_6(%arg0: i32, %arg1: i32) -> (i32, i32) {
    %c0_i32 = arith.constant 0 : i32
    %c0_i32_0 = arith.constant 0 : i32
    return %arg0, %c0_i32 : i32, i32
  }
}

</mosaic_0001>

<bundles_post_ra>
// kernel: tpu_custom_call.1
= control target key start
LH: loop header
LB: loop body
LE: loop exit
PB: predicated region body
PF: predicated region fallthrough
CT: control target
= control target key end

     0   :  { %v763_v3 = vmov 0   ;;  %vm64_vm0 = vcmask 261120   ;;  %s1028_s0 = inlined_call_operand.vmem [shape: bf16[128,128], index: 0, kind: input, shape index: {}]   ;;  %s1029_s1 = inlined_call_operand.vmem [shape: f32[128,32], index: 1, kind: input, shape index: {}]   ;;  %s1030_s2 = inlined_call_operand.vmem [shape: f32[32,128], index: 2, kind: input, shape index: {}]   ;;  %s1031_s3 = inlined_call_operand.vmem [shape: f32[128,1], index: 3, kind: input, shape index: {}]   ;;  %s1032_s4 = inlined_call_operand.vmem [shape: f32[128,1], index: 4, kind: input, shape index: {}]   ;;  %s1033_s5 = inlined_call_operand.vmem [shape: f32[1,128], index: 5, kind: input, shape index: {}]   ;;  %s1034_s6 = inlined_call_operand.hbm [shape: f32[128,128], index: 6, kind: output, shape index: {}]  }
   0x1   :  { %v63_v0 = vld [vmem:[%s1030_s2 + $0x18] sm:$0xff]  ;;  %v192_v1 = vld [vmem:[%s1031_s3 + $0x70] sm:$0xff]  ;;  %v190_v2 = vld [vmem:[%s1031_s3 + $0x60] sm:$0xff]  ;;  %734 = vset.pattern.permute.xlu1 %v763_v3  ;;  %733 = vset.pattern.permute.xlu0 %v763_v3 }
   0x2   :  { %v62_v4 = vld [vmem:[%s1030_s2 + $0x10] sm:$0xff]  ;;  %125 = vmatpush.msra.mxu0 %v63_v0  ;;  %716 = vmatpush.msra.mxu3 %v63_v0  ;;  %v61_v5 = vld [vmem:[%s1030_s2 + $0x8] sm:$0xff]  ;;  %v60_v7 = vld [vmem:[%s1030_s2] sm:$0xff] }
   0x3   :  { %266 = vperm.xlu0 %733, %v192_v1   ;;  %256 = vperm.xlu1 %734, %v190_v2   ;;  %v188_v6 = vld [vmem:[%s1031_s3 + $0x50] sm:$0xff]  ;;  %v44_v8 = vld [vmem:[%s1029_s1] sm:$0xff]  ;;  %v193_v10 = vld [vmem:[%s1031_s3 + $0x78] sm:$0xff] }
   0x4   :  { %126 = vmatpush.msra.mxu0 %v62_v4  ;;  %717 = vmatpush.msra.mxu3 %v62_v4  ;;  %v54_v9 = vld [vmem:[%s1029_s1 + $0x50] sm:$0xff]  ;;  %v191_v11 = vld [vmem:[%s1031_s3 + $0x68] sm:$0xff] }
   0x5   :  { %735 = vset.pattern.permute.xlu2 %v763_v3 }
   0x6   :  { %127 = vmatpush.msra.mxu0 %v61_v5  ;;  %718 = vmatpush.msra.mxu3 %v61_v5 }
   0x7   :  { %246 = vperm.xlu2 %735, %v188_v6  }
   0x8   :  { %128 = vmatpush.msra.mxu0 %v60_v7  ;;  %719 = vmatpush.msra.mxu3 %v60_v7 }
   0x9   :  { %660 = vmatmul.msk.f32.vlgmr.msra.gmra.mxu0 %vm64_vm0, %v44_v8  ;;  %670 = vmatmul.msk.f32.vlgmr.msra.gmra.mxu3 %vm64_vm0, %v54_v9 }
   0xa   :  { %11 = vsyncpa [#allocation3], 0  ;;  %v189_v12 = vld [vmem:[%s1031_s3 + $0x58] sm:$0xff]  ;;  %v45_v13 = vld [vmem:[%s1029_s1 + $0x8] sm:$0xff]  ;;  %s648_s16 = sshll.u32 %s1034_s6, 4  ;;  %s765_s2 = smov 128   ;;  %s649_s16 = int_to_ptr.hbm [resolvable:$true] %s648_s16 }
   0xb   :  { %271 = vperm.xlu0 %733, %v193_v10   ;;  %261 = vperm.xlu1 %734, %v191_v11   ;;  %v55_v14 = vld [vmem:[%s1029_s1 + $0x58] sm:$0xff]  ;;  %v187_v15 = vld [vmem:[%s1031_s3 + $0x48] sm:$0xff]  ;;  %v186_v16 = vld [vmem:[%s1031_s3 + $0x40] sm:$0xff]  ;;  %s766_s17 = smov 8  }
   0xc   :  { %v184_v17 = vld [vmem:[%s1031_s3 + $0x30] sm:$0xff]  ;;  %v56_v19 = vld [vmem:[%s1029_s1 + $0x60] sm:$0xff]  ;;  %v185_v20 = vld [vmem:[%s1031_s3 + $0x38] sm:$0xff] }
   0xd   :  { %v46_v18 = vld [vmem:[%s1029_s1 + $0x10] sm:$0xff]  ;;  %v182_v21 = vld [vmem:[%s1031_s3 + $0x20] sm:$0xff]  ;;  %v183_v22 = vld [vmem:[%s1031_s3 + $0x28] sm:$0xff] }
   0xe   :  { %v47_v23 = vld [vmem:[%s1029_s1 + $0x18] sm:$0xff]  ;;  %v57_v24 = vld [vmem:[%s1029_s1 + $0x68] sm:$0xff]  ;;  %v180_v26 = vld [vmem:[%s1031_s3 + $0x10] sm:$0xff] }
   0xf   :  { %251 = vperm.xlu2 %735, %v189_v12   ;;  %v181_v25 = vld [vmem:[%s1031_s3 + $0x18] sm:$0xff]  ;;  %v178_v27 = vld [vmem:[%s1031_s3] sm:$0xff]  ;;  %v58_v29 = vld [vmem:[%s1029_s1 + $0x70] sm:$0xff] }
  0x10   :  { %v48_v28 = vld [vmem:[%s1029_s1 + $0x20] sm:$0xff]  ;;  %v179_v31 = vld [vmem:[%s1031_s3 + $0x8] sm:$0xff]  ;;  %v59_v34 = vld [vmem:[%s1029_s1 + $0x78] sm:$0xff] }
  0x11   :  { %661 = vmatmul.msk.f32.gmra.mxu0 %vm64_vm0, %v45_v13  ;;  %671 = vmatmul.msk.f32.gmra.mxu3 %vm64_vm0, %v55_v14  ;;  %v478_v30 = vld [vmem:[%s1032_s4] sm:$0xff]  ;;  %v479_v32 = vld [vmem:[%s1032_s4 + $0x8] sm:$0xff]  ;;  %v481_v35 = vld [vmem:[%s1032_s4 + $0x18] sm:$0xff] }
  0x12   :  { %v49_v33 = vld [vmem:[%s1029_s1 + $0x28] sm:$0xff]  ;;  %v480_v36 = vld [vmem:[%s1032_s4 + $0x10] sm:$0xff]  ;;  %v482_v37 = vld [vmem:[%s1032_s4 + $0x20] sm:$0xff] }
  0x13   :  { %241 = vperm.xlu1 %734, %v187_v15   ;;  %236 = vperm.xlu0 %733, %v186_v16   ;;  %v50_v38 = vld [vmem:[%s1029_s1 + $0x30] sm:$0xff]  ;;  %v483_v40 = vld [vmem:[%s1032_s4 + $0x28] sm:$0xff]  ;;  %v485_v41 = vld [vmem:[%s1032_s4 + $0x38] sm:$0xff] }
  0x14   :  { %v484_v39 = vld [vmem:[%s1032_s4 + $0x30] sm:$0xff]  ;;  %v51_v42 = vld [vmem:[%s1029_s1 + $0x38] sm:$0xff]  ;;  %v487_v43 = vld [vmem:[%s1032_s4 + $0x48] sm:$0xff] }
  0x15   :  { %v486_v44 = vld [vmem:[%s1032_s4 + $0x40] sm:$0xff]  ;;  %v488_v45 = vld [vmem:[%s1032_s4 + $0x50] sm:$0xff]  ;;  %v489_v48 = vld [vmem:[%s1032_s4 + $0x58] sm:$0xff] }
  0x16   :  { %v52_v46 = vld [vmem:[%s1029_s1 + $0x40] sm:$0xff]  ;;  %v491_v49 = vld [vmem:[%s1032_s4 + $0x68] sm:$0xff]  ;;  %v493_v51 = vld [vmem:[%s1032_s4 + $0x78] sm:$0xff] }
  0x17   :  { %226 = vperm.xlu2 %735, %v184_v17   ;;  %v490_v47 = vld [vmem:[%s1032_s4 + $0x60] sm:$0xff]  ;;  %v53_v50 = vld [vmem:[%s1029_s1 + $0x48] sm:$0xff]  ;;  %v492_v52 = vld [vmem:[%s1032_s4 + $0x70] sm:$0xff] }
  0x19   :  { %662 = vmatmul.msk.f32.gmra.mxu0 %vm64_vm0, %v46_v18  ;;  %672 = vmatmul.msk.f32.gmra.mxu3 %vm64_vm0, %v56_v19 }
  0x1b   :  { %231 = vperm.xlu0 %733, %v185_v20   ;;  %216 = vperm.xlu1 %734, %v182_v21  }
  0x1f   :  { %221 = vperm.xlu2 %735, %v183_v22  }
  0x21   :  { %663 = vmatmul.msk.f32.gmra.mxu0 %vm64_vm0, %v47_v23  ;;  %673 = vmatmul.msk.f32.gmra.mxu3 %vm64_vm0, %v57_v24 }
  0x23   :  { %211 = vperm.xlu1 %734, %v181_v25   ;;  %206 = vperm.xlu0 %733, %v180_v26  }
  0x27   :  { %196 = vperm.xlu2 %735, %v178_v27  }
  0x29   :  { %664 = vmatmul.msk.f32.gmra.mxu0 %vm64_vm0, %v48_v28  ;;  %674 = vmatmul.msk.f32.gmra.mxu3 %vm64_vm0, %v58_v29 }
  0x2b   :  { %496 = vperm.xlu1 %734, %v478_v30   ;;  %201 = vperm.xlu0 %733, %v179_v31  }
  0x2f   :  { %501 = vperm.xlu2 %735, %v479_v32  }
  0x31   :  { %665 = vmatmul.msk.f32.gmra.mxu0 %vm64_vm0, %v49_v33  ;;  %675 = vmatmul.msk.f32.gmra.mxu3 %vm64_vm0, %v59_v34 }
  0x33   :  { %511 = vperm.xlu1 %734, %v481_v35   ;;  %506 = vperm.xlu0 %733, %v480_v36  }
  0x37   :  { %516 = vperm.xlu2 %735, %v482_v37  }
  0x39   :  { %666 = vmatmul.msk.f32.gmra.mxu0 %vm64_vm0, %v50_v38 }
  0x3b   :  { %526 = vperm.xlu1 %734, %v484_v39   ;;  %521 = vperm.xlu0 %733, %v483_v40  }
  0x3f   :  { %531 = vperm.xlu2 %735, %v485_v41  }
  0x41   :  { %667 = vmatmul.msk.f32.gmra.mxu0 %vm64_vm0, %v51_v42 }
  0x43   :  { %541 = vperm.xlu1 %734, %v487_v43   ;;  %536 = vperm.xlu0 %733, %v486_v44  }
  0x47   :  { %546 = vperm.xlu2 %735, %v488_v45   ;;  %v708_v45 = vld [vmem:[%s1028_s0] sm:$0xff] }
  0x49   :  { %668 = vmatmul.msk.f32.gmra.mxu0 %vm64_vm0, %v52_v46  ;;  %v712_v46 = vld [vmem:[%s1028_s0 + $0x20] sm:$0xff] }
  0x4b   :  { %556 = vperm.xlu1 %734, %v490_v47   ;;  %551 = vperm.xlu0 %733, %v489_v48   ;;  %v709_v47 = vld [vmem:[%s1028_s0 + $0x8] sm:$0xff] }
  0x4c   :  { %v713_v48 = vld [vmem:[%s1028_s0 + $0x28] sm:$0xff] }
  0x4f   :  { %561 = vperm.xlu2 %735, %v491_v49   ;;  %v710_v49 = vld [vmem:[%s1028_s0 + $0x10] sm:$0xff] }
  0x51   :  { %669 = vmatmul.msk.f32.gmra.mxu0 %vm64_vm0, %v53_v50  ;;  %v714_v50 = vld [vmem:[%s1028_s0 + $0x30] sm:$0xff] }
  0x53   :  { %571 = vperm.xlu1 %734, %v493_v51   ;;  %566 = vperm.xlu0 %733, %v492_v52   ;;  %v711_v51 = vld [vmem:[%s1028_s0 + $0x18] sm:$0xff] }
  0x54   :  { %v715_v52 = vld [vmem:[%s1028_s0 + $0x38] sm:$0xff]  ;;  %s764_s0 = smov [#allocation2]  }
  0x61   :  { %v247_v53 = vpop.permute.xlu2 %246 }
  0x69   :  { %v252_v55 = vpop.permute.xlu2 %251 }
  0x71   :  { %v227_v59 = vpop.permute.xlu2 %226 }
  0x75   :  { %v267_v54 = vpop.permute.xlu0 %266  ;;  %v257_v12 = vpop.permute.xlu1 %256 }
  0x79   :  { %v222_v63 = vpop.permute.xlu2 %221 }
  0x7d   :  { %v272_v56 = vpop.permute.xlu0 %271  ;;  %v262_v18 = vpop.permute.xlu1 %261 }
  0x81   :  { %v197_v3 = vpop.permute.xlu2 %196 }
  0x85   :  { %v237_v57 = vpop.permute.xlu0 %236  ;;  %v242_v28 = vpop.permute.xlu1 %241 }
  0x86   :  { %v130_v58 = vpop.f32.mrf.mxu0 }
  0x87   :  { %v274_v6 = vmul.f32 %v197_v3, %v130_v58 }
  0x8c   :  { %v160_v60 = vpop.f32.mrf.mxu3 }
  0x8d   :  { %v232_v61 = vpop.permute.xlu0 %231  ;;  %v284_v23 = vmul.f32 %v247_v53, %v160_v60  ;;  %v217_v30 = vpop.permute.xlu1 %216 }
  0x8e   :  { %v133_v62 = vpop.f32.mrf.mxu0 }
  0x94   :  { %v163_v0 = vpop.f32.mrf.mxu3 }
  0x95   :  { %v207_v1 = vpop.permute.xlu0 %206  ;;  %v285_v24 = vmul.f32 %v252_v55, %v163_v0  ;;  %v212_v40 = vpop.permute.xlu1 %211 }
  0x96   :  { %v136_v2 = vpop.f32.mrf.mxu0  ;;  %v502_v55 = vpop.permute.xlu2 %501 }
  0x97   :  { %v311_v27 = vpack.c.bf16 %v285_v24, %v284_v23  ;;  %v276_v43 = vmul.f32 %v207_v1, %v136_v2 }
  0x9c   :  { %v166_v4 = vpop.f32.mrf.mxu3 }
  0x9d   :  { %v202_v5 = vpop.permute.xlu0 %201  ;;  %v286_v20 = vmul.f32 %v257_v12, %v166_v4  ;;  %v497_v53 = vpop.permute.xlu1 %496 }
  0x9e   :  { %v275_v7 = vmul.f32 %v202_v5, %v133_v62  ;;  %v139_v8 = vpop.f32.mrf.mxu0 }
  0x9f   :  { %v277_v41 = vmul.f32 %v212_v40, %v139_v8 }
  0xa0   :  { %v306_v9 = vpack.c.bf16 %v275_v7, %v274_v6 }
  0xa1   :  { %v307_v44 = vpack.c.bf16 %v277_v41, %v276_v43 }
  0xa4   :  { %v169_v10 = vpop.f32.mrf.mxu3 }
  0xa5   :  { %v287_v21 = vmul.f32 %v262_v18, %v169_v10 }
  0xa6   :  { %v142_v11 = vpop.f32.mrf.mxu0 }
  0xa7   :  { %v312_v25 = vpack.c.bf16 %v287_v21, %v286_v20  ;;  %v278_v39 = vmul.f32 %v217_v30, %v142_v11 }
  0xac   :  { %v172_v13 = vpop.f32.mrf.mxu3 }
  0xad   :  { %v288_v15 = vmul.f32 %v267_v54, %v172_v13  ;;  %v507_v54 = vpop.permute.xlu0 %506 }
  0xae   :  { %v145_v14 = vpop.f32.mrf.mxu0 }
  0xaf   :  { %v279_v37 = vmul.f32 %v222_v63, %v145_v14 }
  0xb1   :  { %v308_v42 = vpack.c.bf16 %v279_v37, %v278_v39 }
  0xb4   :  { %v175_v16 = vpop.f32.mrf.mxu3 }
  0xb5   :  { %v289_v17 = vmul.f32 %v272_v56, %v175_v16  ;;  %v512_v56 = vpop.permute.xlu1 %511 }
  0xb6   :  { %v148_v19 = vpop.f32.mrf.mxu0 }
  0xb7   :  { %v313_v22 = vpack.c.bf16 %v289_v17, %v288_v15  ;;  %v280_v36 = vmul.f32 %v227_v59, %v148_v19  ;;  %v1001_v59 = vld [vmem:[%s1033_s5] ss:$0 sm:$0xff]  ;;  %s646_s5 = sshll.u32 %s764_s0, 4  ;;  %s647_s5 = int_to_ptr.vmem [resolvable:$true] %s646_s5 }
  0xb9   :  { %378 = vmatpush.bf16.msra.mxu1 %v313_v22  ;;  %720 = vmatpush.bf16.msra.mxu2 %v313_v22 }
  0xbd   :  { %379 = vmatpush.bf16.msra.mxu1 %v312_v25  ;;  %721 = vmatpush.bf16.msra.mxu2 %v312_v25  ;;  %v1004_v63 = vpop.permute.xlu1 %526 }
  0xbe   :  { %v151_v26 = vpop.f32.mrf.mxu0 }
  0xbf   :  { %v281_v34 = vmul.f32 %v232_v61, %v151_v26  ;;  %v517_v61 = vpop.permute.xlu2 %516 }
  0xc1   :  { %380 = vmatpush.bf16.msra.mxu1 %v311_v27  ;;  %722 = vmatpush.bf16.msra.mxu2 %v311_v27  ;;  %v309_v38 = vpack.c.bf16 %v281_v34, %v280_v36 }
  0xc5   :  { %v542_v12 = vpop.permute.xlu1 %541 }
  0xc6   :  { %v154_v29 = vpop.f32.mrf.mxu0 }
  0xc7   :  { %v282_v32 = vmul.f32 %v237_v57, %v154_v29  ;;  %v522_v57 = vpop.permute.xlu0 %521 }
  0xcd   :  { %v557_v39 = vpop.permute.xlu1 %556 }
  0xce   :  { %v157_v31 = vpop.f32.mrf.mxu0 }
  0xcf   :  { %v283_v33 = vmul.f32 %v242_v28, %v157_v31  ;;  %v537_v2 = vpop.permute.xlu0 %536 }
  0xd1   :  { %v310_v35 = vpack.c.bf16 %v283_v33, %v282_v32 }
  0xd3   :  { %381 = vmatpush.bf16.msra.mxu1 %v310_v35  ;;  %723 = vmatpush.bf16.msra.mxu2 %v310_v35 }
  0xd7   :  { %382 = vmatpush.bf16.msra.mxu1 %v309_v38  ;;  %724 = vmatpush.bf16.msra.mxu2 %v309_v38  ;;  %v552_v30 = vpop.permute.xlu0 %551 }
  0xdb   :  { %383 = vmatpush.bf16.msra.mxu1 %v308_v42  ;;  %725 = vmatpush.bf16.msra.mxu2 %v308_v42 }
  0xdf   :  { %384 = vmatpush.bf16.msra.mxu1 %v307_v44  ;;  %726 = vmatpush.bf16.msra.mxu2 %v307_v44 }
  0xe3   :  { %385 = vmatpush.bf16.msra.mxu1 %v306_v9  ;;  %727 = vmatpush.bf16.msra.mxu2 %v306_v9  ;;  %v1008_v9 = vpop.permute.xlu2 %531 }
  0xe6   :  { %386 = vmatmul.bf16.vlgmr.msra.gmra.mxu1 %v708_v45  ;;  %406 = vmatmul.bf16.vlgmr.msra.gmra.mxu2 %v712_v46 }
  0xeb   :  { %v547_v21 = vpop.permute.xlu2 %546 }
  0xf6   :  { %391 = vmatmul.bf16.gmra.mxu1 %v709_v47  ;;  %411 = vmatmul.bf16.gmra.mxu2 %v713_v48  ;;  %v562_v48 = vpop.permute.xlu2 %561 }
 0x106   :  { %396 = vmatmul.bf16.gmra.mxu1 %v710_v49  ;;  %416 = vmatmul.bf16.gmra.mxu2 %v714_v50 }
 0x116   :  { %401 = vmatmul.bf16.gmra.mxu1 %v711_v51  ;;  %421 = vmatmul.bf16.gmra.mxu2 %v715_v52 }
 0x163   :  { %v387_v58 = vpop.f32.mrf.mxu1 }
 0x164   :  { %v574_v60 = vmul.f32 %v497_v53, %v387_v58 }
 0x166   :  { %v594_v62 = vadd.f32 %v1001_v59, %v574_v60 }
 0x168   :  { %v610_v1 = vmax.f32 %v594_v62, 0.0 }
 0x169   :  { %v407_v0 = vpop.f32.mrf.mxu2 }
 0x16a   :  { %626 = vst [vmem:[#allocation2] sm:$0xff] %v610_v1  ;;  %v582_v4 = vmul.f32 %v537_v2, %v407_v0 }
 0x16b   :  { %v389_v3 = vpop.f32.mrf.mxu1 }
 0x16c   :  { %v602_v5 = vadd.f32 %v1001_v59, %v582_v4  ;;  %v575_v6 = vmul.f32 %v502_v55, %v389_v3  ;;  %v572_v3 = vpop.permute.xlu1 %571 }
 0x16e   :  { %v618_v7 = vmax.f32 %v602_v5, 0.0  ;;  %v595_v8 = vadd.f32 %v1001_v59, %v575_v6 }
 0x170   :  { %634 = vst [vmem:[#allocation2 + $0x40] sm:$0xff] %v618_v7  ;;  %v611_v11 = vmax.f32 %v595_v8, 0.0 }
 0x171   :  { %v409_v10 = vpop.f32.mrf.mxu2 }
 0x172   :  { %627 = vst [vmem:[#allocation2 + $0x8] sm:$0xff] %v611_v11  ;;  %v583_v14 = vmul.f32 %v542_v12, %v409_v10 }
 0x173   :  { %v392_v13 = vpop.f32.mrf.mxu1 }
 0x174   :  { %v603_v15 = vadd.f32 %v1001_v59, %v583_v14  ;;  %v576_v16 = vmul.f32 %v507_v54, %v392_v13 }
 0x176   :  { %v619_v17 = vmax.f32 %v603_v15, 0.0  ;;  %v596_v18 = vadd.f32 %v1001_v59, %v576_v16 }
 0x178   :  { %635 = vst [vmem:[#allocation2 + $0x48] sm:$0xff] %v619_v17  ;;  %v612_v20 = vmax.f32 %v596_v18, 0.0 }
 0x179   :  { %v412_v19 = vpop.f32.mrf.mxu2 }
 0x17a   :  { %628 = vst [vmem:[#allocation2 + $0x10] sm:$0xff] %v612_v20  ;;  %v584_v23 = vmul.f32 %v547_v21, %v412_v19 }
 0x17b   :  { %v394_v22 = vpop.f32.mrf.mxu1 }
 0x17c   :  { %v604_v24 = vadd.f32 %v1001_v59, %v584_v23  ;;  %v577_v25 = vmul.f32 %v512_v56, %v394_v22 }
 0x17e   :  { %v620_v26 = vmax.f32 %v604_v24, 0.0  ;;  %v597_v27 = vadd.f32 %v1001_v59, %v577_v25 }
 0x180   :  { %636 = vst [vmem:[#allocation2 + $0x50] sm:$0xff] %v620_v26  ;;  %v613_v29 = vmax.f32 %v597_v27, 0.0 }
 0x181   :  { %v414_v28 = vpop.f32.mrf.mxu2 }
 0x182   :  { %629 = vst [vmem:[#allocation2 + $0x18] sm:$0xff] %v613_v29  ;;  %v585_v32 = vmul.f32 %v552_v30, %v414_v28 }
 0x183   :  { %v397_v31 = vpop.f32.mrf.mxu1 }
 0x184   :  { %v605_v33 = vadd.f32 %v1001_v59, %v585_v32  ;;  %v578_v34 = vmul.f32 %v517_v61, %v397_v31 }
 0x186   :  { %v621_v35 = vmax.f32 %v605_v33, 0.0  ;;  %v598_v36 = vadd.f32 %v1001_v59, %v578_v34 }
 0x188   :  { %637 = vst [vmem:[#allocation2 + $0x58] sm:$0xff] %v621_v35  ;;  %v614_v38 = vmax.f32 %v598_v36, 0.0 }
 0x189   :  { %v417_v37 = vpop.f32.mrf.mxu2 }
 0x18a   :  { %630 = vst [vmem:[#allocation2 + $0x20] sm:$0xff] %v614_v38  ;;  %v586_v41 = vmul.f32 %v557_v39, %v417_v37 }
 0x18b   :  { %v399_v40 = vpop.f32.mrf.mxu1 }
 0x18c   :  { %v606_v42 = vadd.f32 %v1001_v59, %v586_v41  ;;  %v579_v43 = vmul.f32 %v522_v57, %v399_v40  ;;  %v567_v57 = vpop.permute.xlu0 %566 }
 0x18e   :  { %v622_v44 = vmax.f32 %v606_v42, 0.0  ;;  %v599_v45 = vadd.f32 %v1001_v59, %v579_v43 }
 0x190   :  { %638 = vst [vmem:[#allocation2 + $0x60] sm:$0xff] %v622_v44  ;;  %v615_v47 = vmax.f32 %v599_v45, 0.0 }
 0x191   :  { %v419_v46 = vpop.f32.mrf.mxu2 }
 0x192   :  { %631 = vst [vmem:[#allocation2 + $0x28] sm:$0xff] %v615_v47  ;;  %v587_v50 = vmul.f32 %v562_v48, %v419_v46 }
 0x193   :  { %v402_v49 = vpop.f32.mrf.mxu1 }
 0x194   :  { %v607_v51 = vadd.f32 %v1001_v59, %v587_v50  ;;  %v580_v52 = vmul.f32 %v1004_v63, %v402_v49 }
 0x196   :  { %v623_v53 = vmax.f32 %v607_v51, 0.0  ;;  %v600_v54 = vadd.f32 %v1001_v59, %v580_v52 }
 0x198   :  { %639 = vst [vmem:[#allocation2 + $0x68] sm:$0xff] %v623_v53  ;;  %v616_v56 = vmax.f32 %v600_v54, 0.0 }
 0x199   :  { %v422_v55 = vpop.f32.mrf.mxu2 }
 0x19a   :  { %632 = vst [vmem:[#allocation2 + $0x30] sm:$0xff] %v616_v56  ;;  %v588_v60 = vmul.f32 %v567_v57, %v422_v55 }
 0x19b   :  { %v404_v58 = vpop.f32.mrf.mxu1 }
 0x19c   :  { %v608_v61 = vadd.f32 %v1001_v59, %v588_v60  ;;  %v581_v62 = vmul.f32 %v1008_v9, %v404_v58 }
 0x19e   :  { %v624_v0 = vmax.f32 %v608_v61, 0.0  ;;  %v601_v1 = vadd.f32 %v1001_v59, %v581_v62 }
 0x1a0   :  { %640 = vst [vmem:[#allocation2 + $0x70] sm:$0xff] %v624_v0  ;;  %v617_v63 = vmax.f32 %v601_v1, 0.0 }
 0x1a1   :  { %v424_v2 = vpop.f32.mrf.mxu2 }
 0x1a2   :  { %633 = vst [vmem:[#allocation2 + $0x38] sm:$0xff] %v617_v63  ;;  %v589_v4 = vmul.f32 %v572_v3, %v424_v2 }
 0x1a4   :  { %v609_v5 = vadd.f32 %v1001_v59, %v589_v4 }
 0x1a6   :  { %v625_v6 = vmax.f32 %v609_v5, 0.0 }
 0x1a8   :  { %641 = vst [vmem:[#allocation2 + $0x78] sm:$0xff] %v625_v6 }
 0x1a9   :  { %654 = dma.vmem_to_hbm [thread:$0]  %s647_s5, 2048, %s649_s16, [#allocation3], %s765_s2, %s765_s2, %s766_s17  }
 0x1aa   :  { %761 = dma.done.wait [#allocation3], 2048  }
 0x1ab   :  { %762 = vsyncadd [#allocation3], 4294965248 }
 0x1ac   :  { %659 = vsyncpa [#allocation3], 1 }

</bundles_post_ra>
